<compile_context>
chip_gen: v6e
topology: v6e:2x2x1
jax: 0.10.0
libtpu: 0.0.40
codegen_flags: <defaults>
</compile_context>

<pallas_src>
import jax
import jax.numpy as jnp
from jax.experimental import pallas as pl
from jax.experimental.pallas import tpu as pltpu


# ----------------------------------------------------------------------------
# Pallas kernel: per-image 1x1 conv (VPU FMA) + bias + ReLU, lane-dense on H*W
# ----------------------------------------------------------------------------
def _pointwise_conv_relu_kernel(x_ref, w_ref, b_ref, o_ref):
    # x_ref: (1, Cin,  HW) f32 VMEM   (HW on the lane axis)
    # w_ref: (Cout, Cin)   f32 SMEM   (scalars)
    # b_ref: (1, Cout)     f32 SMEM   (scalars)
    # o_ref: (1, Cout, HW) f32 VMEM
    x = x_ref[0]                                   # (Cin, HW) in vregs
    cin, _hw = x.shape
    cout = o_ref.shape[1]

    rows = []
    for co in range(cout):                         # static unroll (Cout = 8)
        acc = w_ref[co, 0] * x[0:1, :]             # (1, HW) VPU FMA chain
        for ci in range(1, cin):                   # static unroll (Cin = 4)
            acc = acc + w_ref[co, ci] * x[ci:ci + 1, :]
        acc = acc + b_ref[0, co]                   # bias as free scalar operand
        rows.append(jnp.maximum(acc, 0.0))
    # Single lane-dense store of the full (Cout, HW) block (no masked vst).
    o_ref[0] = jnp.concatenate(rows, axis=0)


def _pointwise_conv_relu(x3, w, b):
    """x3: (N, Cin, HW) f32, w: (Cout, Cin) f32, b: (1, Cout) f32 -> (N, Cout, HW)."""
    n, cin, hw = x3.shape
    cout = w.shape[0]
    flops = 2 * n * hw * cin * cout
    bytes_accessed = 4 * (n * cin * hw + cout * cin + cout + n * cout * hw)
    return pl.pallas_call(
        _pointwise_conv_relu_kernel,
        out_shape=jax.ShapeDtypeStruct((n, cout, hw), jnp.float32),
        grid=(n,),
        in_specs=[
            pl.BlockSpec((1, cin, hw), lambda i: (i, 0, 0)),
            pl.BlockSpec(memory_space=pltpu.MemorySpace.SMEM),
            pl.BlockSpec(memory_space=pltpu.MemorySpace.SMEM),
        ],
        out_specs=pl.BlockSpec((1, cout, hw), lambda i: (i, 0, 0)),
        compiler_params=pltpu.CompilerParams(
            dimension_semantics=("parallel",)),
        cost_estimate=pl.CostEstimate(
            flops=flops, transcendentals=0, bytes_accessed=bytes_accessed),
    )(x3, w, b)


@jax.jit
def _conv1x1_relu_nchw(x, w, b):
    # x: (N, Cin, H, W) NCHW; w: (Cout, Cin); b: (1, Cout)
    n, c, h, wd = x.shape
    x3 = x.reshape(n, c, h * wd)          # free view of NCHW (no transpose)
    y3 = _pointwise_conv_relu(x3, w, b)   # (N, Cout, H*W)
    return y3.reshape(n, w.shape[0], h, wd)  # back to NCHW, zero transposes


# ----------------------------------------------------------------------------
# Inner model: Conv2d(Cin, Cout, kernel_size=1) + ReLU   (NCHW interface)
# ----------------------------------------------------------------------------
class InnerModel:
    def __init__(self, c_in, c_out, key):
        kw, kb = jax.random.split(key)
        # Deterministic "rank-0" parameters (what broadcastParams would sync).
        # weight layout matches PyTorch Conv2d 1x1: (Cout, Cin).
        self.weight = jax.random.normal(kw, (c_out, c_in), jnp.float32) * 0.1
        self.bias = jax.random.normal(kb, (1, c_out), jnp.float32) * 0.1

    def state_dict(self):
        return {"weight": self.weight, "bias": self.bias}

    def __call__(self, x):
        # x: (N, Cin, H, W) float32 (PyTorch NCHW convention)
        return _conv1x1_relu_nchw(x, self.weight, self.bias)


# ----------------------------------------------------------------------------
# DisttributedModel wrapper
# ----------------------------------------------------------------------------
def broadcastParams(model):
    # Single-device stand-in for torch.distributed.broadcast(p, 0): every
    # replica ends up with rank-0's parameter values (identity on one device).
    # TODO(synk): multi-chip broadcast would use pltpu.make_async_remote_copy
    # with pltpu.get_barrier_semaphore + CompilerParams(collective_id=...).
    for _ in model.state_dict().values():
        pass
    return model


class DisttributedModel:
    def __init__(self, model):
        self.model = model
        broadcastParams(self.model)
        self.training = True

    def __call__(self, *inputs, **kwargs):
        return self.model(*inputs, **kwargs)

    # forward() just delegates to the wrapped model, like the PyTorch module.
    forward = __call__

    def train(self, mode=True):
        self.training = mode
        return self


# ----------------------------------------------------------------------------
if __name__ == "__main__":
    key = jax.random.PRNGKey(0)
    k_param, k_x = jax.random.split(key)

    N, C_IN, H, W = 2, 4, 16, 16
    C_OUT = 8

    inner = InnerModel(C_IN, C_OUT, k_param)
    dist_model = DisttributedModel(inner)

    x = jax.random.normal(k_x, (N, C_IN, H, W), jnp.float32)

    out = dist_model(x)
    out = jax.block_until_ready(out)

    # Sanity check against a pure-JAX reference of the same inner model (NCHW).
    ref = jnp.einsum("oc,nchw->nohw", inner.weight, x) \
        + inner.bias.reshape(1, C_OUT, 1, 1)
    ref = jnp.maximum(ref, 0.0)
    assert out.shape == (N, C_OUT, H, W)
    assert jnp.allclose(out, ref, atol=1e-5, rtol=1e-5)

    print("KERNEL_OK")
</pallas_src>

<mosaic_0001>
module attributes {stable_mosaic.version = 11 : i64} {
  func.func @_pointwise_conv_relu_kernel(%arg0: i32, %arg1: memref<1x4x256xf32, #tpu.memory_space<vmem>>, %arg2: memref<8x4xf32, #tpu.memory_space<smem>>, %arg3: memref<1x8xf32, #tpu.memory_space<smem>>, %arg4: memref<1x8x256xf32, #tpu.memory_space<vmem>>) attributes {dimension_semantics = [#tpu.dimension_semantics<parallel>], iteration_bounds = array<i64: 2>, scalar_prefetch = 0 : i64, scratch_operands = 0 : i64, tpu.core_type = #tpu.core_type<tc>, window_params = [{transform_indices = @transform_0, window_bounds = array<i64: 1, 4, 256>}, {transform_indices = @transform_1, window_bounds = array<i64: 8, 4>}, {transform_indices = @transform_2, window_bounds = array<i64: 1, 8>}, {transform_indices = @transform_3, window_bounds = array<i64: 1, 8, 256>}]} {
    %c0 = arith.constant 0 : index
    %c0_0 = arith.constant 0 : index
    %c0_1 = arith.constant 0 : index
    %0 = vector.load %arg1[%c0, %c0_0, %c0_1] : memref<1x4x256xf32, #tpu.memory_space<vmem>>, vector<1x4x256xf32>
    %1 = vector.shape_cast %0 : vector<1x4x256xf32> to vector<4x256xf32>
    %c0_2 = arith.constant 0 : index
    %c0_3 = arith.constant 0 : index
    %2 = memref.load %arg2[%c0_2, %c0_3] : memref<8x4xf32, #tpu.memory_space<smem>>
    %3 = vector.extract_strided_slice %1 {offsets = [0, 0], sizes = [1, 256], strides = [1, 1]} : vector<4x256xf32> to vector<1x256xf32>
    %4 = vector.broadcast %2 : f32 to vector<1x256xf32>
    %5 = arith.mulf %4, %3 : vector<1x256xf32>
    %c0_4 = arith.constant 0 : index
    %c1 = arith.constant 1 : index
    %6 = memref.load %arg2[%c0_4, %c1] : memref<8x4xf32, #tpu.memory_space<smem>>
    %7 = vector.extract_strided_slice %1 {offsets = [1, 0], sizes = [1, 256], strides = [1, 1]} : vector<4x256xf32> to vector<1x256xf32>
    %8 = vector.broadcast %6 : f32 to vector<1x256xf32>
    %9 = arith.mulf %8, %7 : vector<1x256xf32>
    %10 = arith.addf %5, %9 : vector<1x256xf32>
    %c0_5 = arith.constant 0 : index
    %c2 = arith.constant 2 : index
    %11 = memref.load %arg2[%c0_5, %c2] : memref<8x4xf32, #tpu.memory_space<smem>>
    %12 = vector.extract_strided_slice %1 {offsets = [2, 0], sizes = [1, 256], strides = [1, 1]} : vector<4x256xf32> to vector<1x256xf32>
    %13 = vector.broadcast %11 : f32 to vector<1x256xf32>
    %14 = arith.mulf %13, %12 : vector<1x256xf32>
    %15 = arith.addf %10, %14 : vector<1x256xf32>
    %c0_6 = arith.constant 0 : index
    %c3 = arith.constant 3 : index
    %16 = memref.load %arg2[%c0_6, %c3] : memref<8x4xf32, #tpu.memory_space<smem>>
    %17 = vector.extract_strided_slice %1 {offsets = [3, 0], sizes = [1, 256], strides = [1, 1]} : vector<4x256xf32> to vector<1x256xf32>
    %18 = vector.broadcast %16 : f32 to vector<1x256xf32>
    %19 = arith.mulf %18, %17 : vector<1x256xf32>
    %20 = arith.addf %15, %19 : vector<1x256xf32>
    %c0_7 = arith.constant 0 : index
    %c0_8 = arith.constant 0 : index
    %21 = memref.load %arg3[%c0_7, %c0_8] : memref<1x8xf32, #tpu.memory_space<smem>>
    %22 = vector.broadcast %21 : f32 to vector<1x256xf32>
    %23 = arith.addf %20, %22 : vector<1x256xf32>
    %cst = arith.constant 0.000000e+00 : f32
    %24 = vector.broadcast %cst : f32 to vector<1x256xf32>
    %25 = arith.maximumf %23, %24 : vector<1x256xf32>
    %c1_9 = arith.constant 1 : index
    %c0_10 = arith.constant 0 : index
    %26 = memref.load %arg2[%c1_9, %c0_10] : memref<8x4xf32, #tpu.memory_space<smem>>
    %27 = vector.extract_strided_slice %1 {offsets = [0, 0], sizes = [1, 256], strides = [1, 1]} : vector<4x256xf32> to vector<1x256xf32>
    %28 = vector.broadcast %26 : f32 to vector<1x256xf32>
    %29 = arith.mulf %28, %27 : vector<1x256xf32>
    %c1_11 = arith.constant 1 : index
    %c1_12 = arith.constant 1 : index
    %30 = memref.load %arg2[%c1_11, %c1_12] : memref<8x4xf32, #tpu.memory_space<smem>>
    %31 = vector.extract_strided_slice %1 {offsets = [1, 0], sizes = [1, 256], strides = [1, 1]} : vector<4x256xf32> to vector<1x256xf32>
    %32 = vector.broadcast %30 : f32 to vector<1x256xf32>
    %33 = arith.mulf %32, %31 : vector<1x256xf32>
    %34 = arith.addf %29, %33 : vector<1x256xf32>
    %c1_13 = arith.constant 1 : index
    %c2_14 = arith.constant 2 : index
    %35 = memref.load %arg2[%c1_13, %c2_14] : memref<8x4xf32, #tpu.memory_space<smem>>
    %36 = vector.extract_strided_slice %1 {offsets = [2, 0], sizes = [1, 256], strides = [1, 1]} : vector<4x256xf32> to vector<1x256xf32>
    %37 = vector.broadcast %35 : f32 to vector<1x256xf32>
    %38 = arith.mulf %37, %36 : vector<1x256xf32>
    %39 = arith.addf %34, %38 : vector<1x256xf32>
    %c1_15 = arith.constant 1 : index
    %c3_16 = arith.constant 3 : index
    %40 = memref.load %arg2[%c1_15, %c3_16] : memref<8x4xf32, #tpu.memory_space<smem>>
    %41 = vector.extract_strided_slice %1 {offsets = [3, 0], sizes = [1, 256], strides = [1, 1]} : vector<4x256xf32> to vector<1x256xf32>
    %42 = vector.broadcast %40 : f32 to vector<1x256xf32>
    %43 = arith.mulf %42, %41 : vector<1x256xf32>
    %44 = arith.addf %39, %43 : vector<1x256xf32>
    %c0_17 = arith.constant 0 : index
    %c1_18 = arith.constant 1 : index
    %45 = memref.load %arg3[%c0_17, %c1_18] : memref<1x8xf32, #tpu.memory_space<smem>>
    %46 = vector.broadcast %45 : f32 to vector<1x256xf32>
    %47 = arith.addf %44, %46 : vector<1x256xf32>
    %cst_19 = arith.constant 0.000000e+00 : f32
    %48 = vector.broadcast %cst_19 : f32 to vector<1x256xf32>
    %49 = arith.maximumf %47, %48 : vector<1x256xf32>
    %c2_20 = arith.constant 2 : index
    %c0_21 = arith.constant 0 : index
    %50 = memref.load %arg2[%c2_20, %c0_21] : memref<8x4xf32, #tpu.memory_space<smem>>
    %51 = vector.extract_strided_slice %1 {offsets = [0, 0], sizes = [1, 256], strides = [1, 1]} : vector<4x256xf32> to vector<1x256xf32>
    %52 = vector.broadcast %50 : f32 to vector<1x256xf32>
    %53 = arith.mulf %52, %51 : vector<1x256xf32>
    %c2_22 = arith.constant 2 : index
    %c1_23 = arith.constant 1 : index
    %54 = memref.load %arg2[%c2_22, %c1_23] : memref<8x4xf32, #tpu.memory_space<smem>>
    %55 = vector.extract_strided_slice %1 {offsets = [1, 0], sizes = [1, 256], strides = [1, 1]} : vector<4x256xf32> to vector<1x256xf32>
    %56 = vector.broadcast %54 : f32 to vector<1x256xf32>
    %57 = arith.mulf %56, %55 : vector<1x256xf32>
    %58 = arith.addf %53, %57 : vector<1x256xf32>
    %c2_24 = arith.constant 2 : index
    %c2_25 = arith.constant 2 : index
    %59 = memref.load %arg2[%c2_24, %c2_25] : memref<8x4xf32, #tpu.memory_space<smem>>
    %60 = vector.extract_strided_slice %1 {offsets = [2, 0], sizes = [1, 256], strides = [1, 1]} : vector<4x256xf32> to vector<1x256xf32>
    %61 = vector.broadcast %59 : f32 to vector<1x256xf32>
    %62 = arith.mulf %61, %60 : vector<1x256xf32>
    %63 = arith.addf %58, %62 : vector<1x256xf32>
    %c2_26 = arith.constant 2 : index
    %c3_27 = arith.constant 3 : index
    %64 = memref.load %arg2[%c2_26, %c3_27] : memref<8x4xf32, #tpu.memory_space<smem>>
    %65 = vector.extract_strided_slice %1 {offsets = [3, 0], sizes = [1, 256], strides = [1, 1]} : vector<4x256xf32> to vector<1x256xf32>
    %66 = vector.broadcast %64 : f32 to vector<1x256xf32>
    %67 = arith.mulf %66, %65 : vector<1x256xf32>
    %68 = arith.addf %63, %67 : vector<1x256xf32>
    %c0_28 = arith.constant 0 : index
    %c2_29 = arith.constant 2 : index
    %69 = memref.load %arg3[%c0_28, %c2_29] : memref<1x8xf32, #tpu.memory_space<smem>>
    %70 = vector.broadcast %69 : f32 to vector<1x256xf32>
    %71 = arith.addf %68, %70 : vector<1x256xf32>
    %cst_30 = arith.constant 0.000000e+00 : f32
    %72 = vector.broadcast %cst_30 : f32 to vector<1x256xf32>
    %73 = arith.maximumf %71, %72 : vector<1x256xf32>
    %c3_31 = arith.constant 3 : index
    %c0_32 = arith.constant 0 : index
    %74 = memref.load %arg2[%c3_31, %c0_32] : memref<8x4xf32, #tpu.memory_space<smem>>
    %75 = vector.extract_strided_slice %1 {offsets = [0, 0], sizes = [1, 256], strides = [1, 1]} : vector<4x256xf32> to vector<1x256xf32>
    %76 = vector.broadcast %74 : f32 to vector<1x256xf32>
    %77 = arith.mulf %76, %75 : vector<1x256xf32>
    %c3_33 = arith.constant 3 : index
    %c1_34 = arith.constant 1 : index
    %78 = memref.load %arg2[%c3_33, %c1_34] : memref<8x4xf32, #tpu.memory_space<smem>>
    %79 = vector.extract_strided_slice %1 {offsets = [1, 0], sizes = [1, 256], strides = [1, 1]} : vector<4x256xf32> to vector<1x256xf32>
    %80 = vector.broadcast %78 : f32 to vector<1x256xf32>
    %81 = arith.mulf %80, %79 : vector<1x256xf32>
    %82 = arith.addf %77, %81 : vector<1x256xf32>
    %c3_35 = arith.constant 3 : index
    %c2_36 = arith.constant 2 : index
    %83 = memref.load %arg2[%c3_35, %c2_36] : memref<8x4xf32, #tpu.memory_space<smem>>
    %84 = vector.extract_strided_slice %1 {offsets = [2, 0], sizes = [1, 256], strides = [1, 1]} : vector<4x256xf32> to vector<1x256xf32>
    %85 = vector.broadcast %83 : f32 to vector<1x256xf32>
    %86 = arith.mulf %85, %84 : vector<1x256xf32>
    %87 = arith.addf %82, %86 : vector<1x256xf32>
    %c3_37 = arith.constant 3 : index
    %c3_38 = arith.constant 3 : index
    %88 = memref.load %arg2[%c3_37, %c3_38] : memref<8x4xf32, #tpu.memory_space<smem>>
    %89 = vector.extract_strided_slice %1 {offsets = [3, 0], sizes = [1, 256], strides = [1, 1]} : vector<4x256xf32> to vector<1x256xf32>
    %90 = vector.broadcast %88 : f32 to vector<1x256xf32>
    %91 = arith.mulf %90, %89 : vector<1x256xf32>
    %92 = arith.addf %87, %91 : vector<1x256xf32>
    %c0_39 = arith.constant 0 : index
    %c3_40 = arith.constant 3 : index
    %93 = memref.load %arg3[%c0_39, %c3_40] : memref<1x8xf32, #tpu.memory_space<smem>>
    %94 = vector.broadcast %93 : f32 to vector<1x256xf32>
    %95 = arith.addf %92, %94 : vector<1x256xf32>
    %cst_41 = arith.constant 0.000000e+00 : f32
    %96 = vector.broadcast %cst_41 : f32 to vector<1x256xf32>
    %97 = arith.maximumf %95, %96 : vector<1x256xf32>
    %c4 = arith.constant 4 : index
    %c0_42 = arith.constant 0 : index
    %98 = memref.load %arg2[%c4, %c0_42] : memref<8x4xf32, #tpu.memory_space<smem>>
    %99 = vector.extract_strided_slice %1 {offsets = [0, 0], sizes = [1, 256], strides = [1, 1]} : vector<4x256xf32> to vector<1x256xf32>
    %100 = vector.broadcast %98 : f32 to vector<1x256xf32>
    %101 = arith.mulf %100, %99 : vector<1x256xf32>
    %c4_43 = arith.constant 4 : index
    %c1_44 = arith.constant 1 : index
    %102 = memref.load %arg2[%c4_43, %c1_44] : memref<8x4xf32, #tpu.memory_space<smem>>
    %103 = vector.extract_strided_slice %1 {offsets = [1, 0], sizes = [1, 256], strides = [1, 1]} : vector<4x256xf32> to vector<1x256xf32>
    %104 = vector.broadcast %102 : f32 to vector<1x256xf32>
    %105 = arith.mulf %104, %103 : vector<1x256xf32>
    %106 = arith.addf %101, %105 : vector<1x256xf32>
    %c4_45 = arith.constant 4 : index
    %c2_46 = arith.constant 2 : index
    %107 = memref.load %arg2[%c4_45, %c2_46] : memref<8x4xf32, #tpu.memory_space<smem>>
    %108 = vector.extract_strided_slice %1 {offsets = [2, 0], sizes = [1, 256], strides = [1, 1]} : vector<4x256xf32> to vector<1x256xf32>
    %109 = vector.broadcast %107 : f32 to vector<1x256xf32>
    %110 = arith.mulf %109, %108 : vector<1x256xf32>
    %111 = arith.addf %106, %110 : vector<1x256xf32>
    %c4_47 = arith.constant 4 : index
    %c3_48 = arith.constant 3 : index
    %112 = memref.load %arg2[%c4_47, %c3_48] : memref<8x4xf32, #tpu.memory_space<smem>>
    %113 = vector.extract_strided_slice %1 {offsets = [3, 0], sizes = [1, 256], strides = [1, 1]} : vector<4x256xf32> to vector<1x256xf32>
    %114 = vector.broadcast %112 : f32 to vector<1x256xf32>
    %115 = arith.mulf %114, %113 : vector<1x256xf32>
    %116 = arith.addf %111, %115 : vector<1x256xf32>
    %c0_49 = arith.constant 0 : index
    %c4_50 = arith.constant 4 : index
    %117 = memref.load %arg3[%c0_49, %c4_50] : memref<1x8xf32, #tpu.memory_space<smem>>
    %118 = vector.broadcast %117 : f32 to vector<1x256xf32>
    %119 = arith.addf %116, %118 : vector<1x256xf32>
    %cst_51 = arith.constant 0.000000e+00 : f32
    %120 = vector.broadcast %cst_51 : f32 to vector<1x256xf32>
    %121 = arith.maximumf %119, %120 : vector<1x256xf32>
    %c5 = arith.constant 5 : index
    %c0_52 = arith.constant 0 : index
    %122 = memref.load %arg2[%c5, %c0_52] : memref<8x4xf32, #tpu.memory_space<smem>>
    %123 = vector.extract_strided_slice %1 {offsets = [0, 0], sizes = [1, 256], strides = [1, 1]} : vector<4x256xf32> to vector<1x256xf32>
    %124 = vector.broadcast %122 : f32 to vector<1x256xf32>
    %125 = arith.mulf %124, %123 : vector<1x256xf32>
    %c5_53 = arith.constant 5 : index
    %c1_54 = arith.constant 1 : index
    %126 = memref.load %arg2[%c5_53, %c1_54] : memref<8x4xf32, #tpu.memory_space<smem>>
    %127 = vector.extract_strided_slice %1 {offsets = [1, 0], sizes = [1, 256], strides = [1, 1]} : vector<4x256xf32> to vector<1x256xf32>
    %128 = vector.broadcast %126 : f32 to vector<1x256xf32>
    %129 = arith.mulf %128, %127 : vector<1x256xf32>
    %130 = arith.addf %125, %129 : vector<1x256xf32>
    %c5_55 = arith.constant 5 : index
    %c2_56 = arith.constant 2 : index
    %131 = memref.load %arg2[%c5_55, %c2_56] : memref<8x4xf32, #tpu.memory_space<smem>>
    %132 = vector.extract_strided_slice %1 {offsets = [2, 0], sizes = [1, 256], strides = [1, 1]} : vector<4x256xf32> to vector<1x256xf32>
    %133 = vector.broadcast %131 : f32 to vector<1x256xf32>
    %134 = arith.mulf %133, %132 : vector<1x256xf32>
    %135 = arith.addf %130, %134 : vector<1x256xf32>
    %c5_57 = arith.constant 5 : index
    %c3_58 = arith.constant 3 : index
    %136 = memref.load %arg2[%c5_57, %c3_58] : memref<8x4xf32, #tpu.memory_space<smem>>
    %137 = vector.extract_strided_slice %1 {offsets = [3, 0], sizes = [1, 256], strides = [1, 1]} : vector<4x256xf32> to vector<1x256xf32>
    %138 = vector.broadcast %136 : f32 to vector<1x256xf32>
    %139 = arith.mulf %138, %137 : vector<1x256xf32>
    %140 = arith.addf %135, %139 : vector<1x256xf32>
    %c0_59 = arith.constant 0 : index
    %c5_60 = arith.constant 5 : index
    %141 = memref.load %arg3[%c0_59, %c5_60] : memref<1x8xf32, #tpu.memory_space<smem>>
    %142 = vector.broadcast %141 : f32 to vector<1x256xf32>
    %143 = arith.addf %140, %142 : vector<1x256xf32>
    %cst_61 = arith.constant 0.000000e+00 : f32
    %144 = vector.broadcast %cst_61 : f32 to vector<1x256xf32>
    %145 = arith.maximumf %143, %144 : vector<1x256xf32>
    %c6 = arith.constant 6 : index
    %c0_62 = arith.constant 0 : index
    %146 = memref.load %arg2[%c6, %c0_62] : memref<8x4xf32, #tpu.memory_space<smem>>
    %147 = vector.extract_strided_slice %1 {offsets = [0, 0], sizes = [1, 256], strides = [1, 1]} : vector<4x256xf32> to vector<1x256xf32>
    %148 = vector.broadcast %146 : f32 to vector<1x256xf32>
    %149 = arith.mulf %148, %147 : vector<1x256xf32>
    %c6_63 = arith.constant 6 : index
    %c1_64 = arith.constant 1 : index
    %150 = memref.load %arg2[%c6_63, %c1_64] : memref<8x4xf32, #tpu.memory_space<smem>>
    %151 = vector.extract_strided_slice %1 {offsets = [1, 0], sizes = [1, 256], strides = [1, 1]} : vector<4x256xf32> to vector<1x256xf32>
    %152 = vector.broadcast %150 : f32 to vector<1x256xf32>
    %153 = arith.mulf %152, %151 : vector<1x256xf32>
    %154 = arith.addf %149, %153 : vector<1x256xf32>
    %c6_65 = arith.constant 6 : index
    %c2_66 = arith.constant 2 : index
    %155 = memref.load %arg2[%c6_65, %c2_66] : memref<8x4xf32, #tpu.memory_space<smem>>
    %156 = vector.extract_strided_slice %1 {offsets = [2, 0], sizes = [1, 256], strides = [1, 1]} : vector<4x256xf32> to vector<1x256xf32>
    %157 = vector.broadcast %155 : f32 to vector<1x256xf32>
    %158 = arith.mulf %157, %156 : vector<1x256xf32>
    %159 = arith.addf %154, %158 : vector<1x256xf32>
    %c6_67 = arith.constant 6 : index
    %c3_68 = arith.constant 3 : index
    %160 = memref.load %arg2[%c6_67, %c3_68] : memref<8x4xf32, #tpu.memory_space<smem>>
    %161 = vector.extract_strided_slice %1 {offsets = [3, 0], sizes = [1, 256], strides = [1, 1]} : vector<4x256xf32> to vector<1x256xf32>
    %162 = vector.broadcast %160 : f32 to vector<1x256xf32>
    %163 = arith.mulf %162, %161 : vector<1x256xf32>
    %164 = arith.addf %159, %163 : vector<1x256xf32>
    %c0_69 = arith.constant 0 : index
    %c6_70 = arith.constant 6 : index
    %165 = memref.load %arg3[%c0_69, %c6_70] : memref<1x8xf32, #tpu.memory_space<smem>>
    %166 = vector.broadcast %165 : f32 to vector<1x256xf32>
    %167 = arith.addf %164, %166 : vector<1x256xf32>
    %cst_71 = arith.constant 0.000000e+00 : f32
    %168 = vector.broadcast %cst_71 : f32 to vector<1x256xf32>
    %169 = arith.maximumf %167, %168 : vector<1x256xf32>
    %c7 = arith.constant 7 : index
    %c0_72 = arith.constant 0 : index
    %170 = memref.load %arg2[%c7, %c0_72] : memref<8x4xf32, #tpu.memory_space<smem>>
    %171 = vector.extract_strided_slice %1 {offsets = [0, 0], sizes = [1, 256], strides = [1, 1]} : vector<4x256xf32> to vector<1x256xf32>
    %172 = vector.broadcast %170 : f32 to vector<1x256xf32>
    %173 = arith.mulf %172, %171 : vector<1x256xf32>
    %c7_73 = arith.constant 7 : index
    %c1_74 = arith.constant 1 : index
    %174 = memref.load %arg2[%c7_73, %c1_74] : memref<8x4xf32, #tpu.memory_space<smem>>
    %175 = vector.extract_strided_slice %1 {offsets = [1, 0], sizes = [1, 256], strides = [1, 1]} : vector<4x256xf32> to vector<1x256xf32>
    %176 = vector.broadcast %174 : f32 to vector<1x256xf32>
    %177 = arith.mulf %176, %175 : vector<1x256xf32>
    %178 = arith.addf %173, %177 : vector<1x256xf32>
    %c7_75 = arith.constant 7 : index
    %c2_76 = arith.constant 2 : index
    %179 = memref.load %arg2[%c7_75, %c2_76] : memref<8x4xf32, #tpu.memory_space<smem>>
    %180 = vector.extract_strided_slice %1 {offsets = [2, 0], sizes = [1, 256], strides = [1, 1]} : vector<4x256xf32> to vector<1x256xf32>
    %181 = vector.broadcast %179 : f32 to vector<1x256xf32>
    %182 = arith.mulf %181, %180 : vector<1x256xf32>
    %183 = arith.addf %178, %182 : vector<1x256xf32>
    %c7_77 = arith.constant 7 : index
    %c3_78 = arith.constant 3 : index
    %184 = memref.load %arg2[%c7_77, %c3_78] : memref<8x4xf32, #tpu.memory_space<smem>>
    %185 = vector.extract_strided_slice %1 {offsets = [3, 0], sizes = [1, 256], strides = [1, 1]} : vector<4x256xf32> to vector<1x256xf32>
    %186 = vector.broadcast %184 : f32 to vector<1x256xf32>
    %187 = arith.mulf %186, %185 : vector<1x256xf32>
    %188 = arith.addf %183, %187 : vector<1x256xf32>
    %c0_79 = arith.constant 0 : index
    %c7_80 = arith.constant 7 : index
    %189 = memref.load %arg3[%c0_79, %c7_80] : memref<1x8xf32, #tpu.memory_space<smem>>
    %190 = vector.broadcast %189 : f32 to vector<1x256xf32>
    %191 = arith.addf %188, %190 : vector<1x256xf32>
    %cst_81 = arith.constant 0.000000e+00 : f32
    %192 = vector.broadcast %cst_81 : f32 to vector<1x256xf32>
    %193 = arith.maximumf %191, %192 : vector<1x256xf32>
    %194 = tpu.concatenate %25, %49, %73, %97, %121, %145, %169, %193 in 0 : vector<1x256xf32>, vector<1x256xf32>, vector<1x256xf32>, vector<1x256xf32>, vector<1x256xf32>, vector<1x256xf32>, vector<1x256xf32>, vector<1x256xf32> -> vector<8x256xf32>
    %c0_82 = arith.constant 0 : index
    %c0_83 = arith.constant 0 : index
    %c0_84 = arith.constant 0 : index
    %195 = vector.load %arg4[%c0_82, %c0_83, %c0_84] : memref<1x8x256xf32, #tpu.memory_space<vmem>>, vector<1x8x256xf32>
    %196 = vector.shape_cast %195 : vector<1x8x256xf32> to vector<8x256xf32>
    %197 = vector.shape_cast %194 : vector<8x256xf32> to vector<1x8x256xf32>
    tpu.vector_store %arg4[%c0_82, %c0_83, %c0_84], %197 {strides = array<i32>} : memref<1x8x256xf32, #tpu.memory_space<vmem>>, vector<1x8x256xf32>,
    return
  }
  func.func @transform_0(%arg0: i32) -> (i32, i32, i32) {
    %c0_i32 = arith.constant 0 : i32
    %c0_i32_0 = arith.constant 0 : i32
    %c0_i32_1 = arith.constant 0 : i32
    return %arg0, %c0_i32, %c0_i32_0 : i32, i32, i32
  }
  func.func @transform_1(%arg0: i32) -> (i32, i32) {
    %c0_i32 = arith.constant 0 : i32
    %c0_i32_0 = arith.constant 0 : i32
    %c0_i32_1 = arith.constant 0 : i32
    return %c0_i32, %c0_i32_0 : i32, i32
  }
  func.func @transform_2(%arg0: i32) -> (i32, i32) {
    %c0_i32 = arith.constant 0 : i32
    %c0_i32_0 = arith.constant 0 : i32
    %c0_i32_1 = arith.constant 0 : i32
    return %c0_i32, %c0_i32_0 : i32, i32
  }
  func.func @transform_3(%arg0: i32) -> (i32, i32, i32) {
    %c0_i32 = arith.constant 0 : i32
    %c0_i32_0 = arith.constant 0 : i32
    %c0_i32_1 = arith.constant 0 : i32
    return %arg0, %c0_i32, %c0_i32_0 : i32, i32, i32
  }
}

</mosaic_0001>

<bundles_post_ra>
// kernel: _conv1x1_relu_nchw.1
= control target key start
LH: loop header
LB: loop body
LE: loop exit
PB: predicated region body
PF: predicated region fallthrough
CT: control target
= control target key end

     0   :  { %8 = vsyncpa [#allocation3], 0  ;;  %s1006_s0 = inlined_call_operand.vmem [shape: f32[2,4,256], index: 0, kind: input, shape index: {}]   ;;  %s1007_s1 = inlined_call_operand.vmem [shape: f32[8,4], index: 1, kind: input, shape index: {}]   ;;  %s1008_s2 = inlined_call_operand.vmem [shape: f32[1,8], index: 2, kind: input, shape index: {}]   ;;  %s1009_s3 = inlined_call_operand.vmem [shape: f32[2,8,256], index: 3, kind: output, shape index: {}]  }
   0x1   :  { %9 = vsyncpa [#allocation5], 0  ;;  %s811_s12 = smov 0  }
   0x2 LB: > { %s817_s13 = sadd.s32 4294967295, %s787_s12   ;;  %p637_p0 = scmp.ge.s32.totalorder %s787_s12, 1  ;;  %s787_s12 = sphi %s811_s12, %s15_s12  }
   0x3   : > { %p114_p1 = scmp.lt.s32.totalorder %s787_s12, 3  ;;  %s127_s16 = sshll.u32 %s1007_s1, 4  ;;  %s128_s16 = int_to_ptr.vmem [resolvable:$true] %s127_s16 }
   0x4   : > { %p1010_p3 = scmp.eq.s32.totalorder %s817_s13, 0  ;;  %s138_s20 = sshll.u32 %s1008_s2, 4  ;;  %s139_s20 = int_to_ptr.vmem [resolvable:$true] %s138_s20 }
   0x5   : > { %p824_p2 = pnand %p637_p0, %p114_p1  ;;  %s743_s22 = scalar_lea.vmem %s128_s16, 128 }
   0x6   : > { %p744_p6 = scmp.ne.s32.totalorder %s128_s16, %s743_s22  ;;  %p751_p10 = scmp.lt.s32.totalorder %s128_s16, %s128_s16 }
   0x7   : > { %s1012_s17 = scalar_select %p824_p2, 1, 0 }
   0x8   : > { %p722_p4 = pneg %p824_p2  ;;  %p752_p11 = scmp.lt.s32.totalorder %s743_s22, %s743_s22 }
   0xa   : > { %p836_p5 = pnand %p1010_p3, %p722_p4  ;;  %p753_p12 = por %p752_p11, %p751_p10 }
   0xc   : > { %p745_p7 = pneg %p836_p5 }
   0xe   : > { %p746_p8 = pnand %p745_p7, %p744_p6 }
  0x10   : > { %p747_p9 = pneg %p746_p8 }
  0x12   : > { %p754_p13 = pnand %p753_p12, %p747_p9 }
  0x14   : > { %757 = shalt.err (!%p754_p13)
}
  0x15   : > { %s789_s23 = smov [#allocation2]   ;;  %s758_s24 = scalar_lea.vmem %s139_s20, 16 }
  0x16   : > { %725 = dma.vmem_to_smem (!%p836_p5), %s128_s16, 128, %s789_s23, [#allocation3]  }
  0x17   : > { %p759_p0 = scmp.ne.s32.totalorder %s139_s20, %s758_s24  ;;  %p766_p3 = scmp.lt.s32.totalorder %s139_s20, %s139_s20 }
  0x18   : > { %p767_p2 = scmp.lt.s32.totalorder %s758_s24, %s758_s24 }
  0x19   : > { %p761_p1 = pnand %p759_p0, %p745_p7 }
  0x1a   : > { %p768_p6 = por %p767_p2, %p766_p3 }
  0x1b   : > { %p762_p4 = pneg %p761_p1 }
  0x1d   : > { %p769_p8 = pnand %p768_p6, %p762_p4 }
  0x1f   : > { %772 = shalt.err (!%p769_p8)
}
  0x20   : > { %s790_s25 = smov [#allocation4]   ;;  %p1014_p9 = scmp.ne.s32.totalorder %s1012_s17, 0 }
  0x21   : > { %728 = dma.vmem_to_smem (!%p836_p5), %s139_s20, 16, %s790_s25, [#allocation5]  }
  0x22   : > { %159 = sbr.rel (%p1014_p9) target bundleno = 107 (0x6b), region = 32  ;;  %p1015_p10 = scmp.eq.s32.totalorder (!%p1014_p9), %s817_s13, 0 }
  0x27   : > { %778 = dma.done.wait (%p1015_p10), [#allocation3], 128   ;;  %p1016_p11 = pmov %p1015_p10 }
  0x28   : > { %p1017_p7 = pmov %p1015_p10 }
  0x29   : > { %780 = vsyncadd (%p1016_p11), [#allocation3], 4294967168 }
  0x2a   : > { %782 = dma.done.wait (%p1017_p7), [#allocation5], 16   ;;  %p1018_p2 = pmov %p1017_p7 }
  0x2c   : > { %784 = vsyncadd (%p1018_p2), [#allocation5], 4294967280 }
  0x2d   : > { %169 = sfence }
  0x2e   : > { %p188_p3 = scmp.lt.s32.totalorder %s817_s13, 1  ;;  %s199_s26 = sld [smem:[#allocation2]]  ;;  %v448_v16 = vlaneseq  ;;  %vm535_vm0 = vcmask 1040384   ;;  %vm538_vm1 = vcmask 1041408   ;;  %vm541_vm2 = vcmask 1042432  }
  0x2f   : > { %s648_s27 = sld [smem:[#allocation2 + $0x1]]  ;;  %vm544_vm3 = vcmask 1043456   ;;  %vm547_vm4 = vcmask 1044480   ;;  %vm550_vm5 = vcmask 1045504   ;;  %vm553_vm6 = vcmask 1046528  }
  0x30   : > { %s1020_s13 = smov (!%p188_p3, %s817_s13), 1  ;;  %s650_s28 = sld [smem:[#allocation2 + $0x2]]  ;;  %v449_v28 = vshrl.u32 %v448_v16, 7 }
  0x31   : > { %s712_s29 = sshll.u32 %s1020_s13, 3  ;;  %s652_s6 = sld [smem:[#allocation2 + $0x3]] }
  0x32   : > { %s192_s5 = scalar_lea.vmem %s1006_s0, %s712_s29  ;;  %s866_s7 = sld [smem:[#allocation4]]  ;;  %v896_v42 = vsub.s32 0, %v449_v28  ;;  %v904_v50 = vsub.s32 4, %v449_v28 }
  0x33   : > { %v864_v0 = vld [vmem:[%s192_s5] sm:$0xff]  ;;  %s654_s8 = sld [smem:[#allocation2 + $0x80]] }
  0x34   : > { %v200_v1 = vstv %s199_s26  ;;  %s655_s9 = sld [smem:[#allocation2 + $0x81]] }
  0x35   : > { %v203_v2 = vstv %s648_s27  ;;  %v201_v3 = vmul.f32 %v200_v1, %v864_v0  ;;  %s657_s10 = sld [smem:[#allocation2 + $0x82]] }
  0x36   : > { %v204_v4 = vmul.f32 %v203_v2, %v864_v0  ;;  %v211_v5 = vstv %s650_s28  ;;  %s659_s11 = sld [smem:[#allocation2 + $0x83]] }
  0x37   : > { %v212_v7 = vmul.f32 %v211_v5, %v864_v0  ;;  %v219_v10 = vstv %s652_s6  ;;  %s871_s14 = sld [smem:[#allocation4 + $0x1]] }
  0x38   : > { %v649_v6 = vrot.slane %v204_v4, 9  ;;  %v220_v11 = vmul.f32 %v219_v10, %v864_v0  ;;  %s662_s15 = sld [smem:[#allocation2 + $0x100]]  ;;  %v227_v21 = vstv %s866_s7 }
  0x39   : > { %v651_v9 = vrot.slane %v212_v7, 10  ;;  %v231_v13 = vstv %s654_s8  ;;  %s663_s16 = sld [smem:[#allocation2 + $0x101]] }
  0x3a   : > { %v209_v8 = vadd.f32 %v649_v6, %v201_v3  ;;  %v653_v14 = vrot.slane %v220_v11, 11  ;;  %v234_v15 = vstv %s655_s9  ;;  %s665_s17 = sld [smem:[#allocation2 + $0x102]]  ;;  %v232_v17 = vmul.f32 %v231_v13, %v864_v0 }
  0x3b   : > { %v235_v18 = vmul.f32 %v234_v15, %v864_v0  ;;  %v242_v19 = vstv %s657_s10  ;;  %s667_s18 = sld [smem:[#allocation2 + $0x103]] }
  0x3c   : > { %v217_v12 = vadd.f32 %v651_v9, %v209_v8  ;;  %v243_v22 = vmul.f32 %v242_v19, %v864_v0  ;;  %v250_v23 = vstv %s659_s11  ;;  %s878_s19 = sld [smem:[#allocation4 + $0x2]] }
  0x3d   : > { %v656_v24 = vrot.slane %v235_v18, 9  ;;  %v251_v25 = vmul.f32 %v250_v23, %v864_v0  ;;  %s881_s20 = sld [smem:[#allocation2 + $0x180]]  ;;  %v258_v39 = vstv %s871_s14 }
  0x3e   : > { %v225_v20 = vadd.f32 %v653_v14, %v217_v12  ;;  %v658_v26 = vrot.slane %v243_v22, 10  ;;  %v262_v27 = vstv %s662_s15  ;;  %s883_s21 = sld [smem:[#allocation2 + $0x181]] }
  0x3f   : > { %v240_v30 = vadd.f32 %v656_v24, %v232_v17  ;;  %v660_v31 = vrot.slane %v251_v25, 11  ;;  %v265_v32 = vstv %s663_s16  ;;  %s673_s22 = sld [smem:[#allocation2 + $0x182]]  ;;  %v263_v33 = vmul.f32 %v262_v27, %v864_v0 }
  0x40   : > { %v228_v29 = vadd.f32 %v227_v21, %v225_v20  ;;  %v266_v34 = vmul.f32 %v265_v32, %v864_v0  ;;  %v273_v35 = vstv %s665_s17  ;;  %s887_s23 = sld [smem:[#allocation2 + $0x183]] }
  0x41   : > { %v248_v36 = vadd.f32 %v658_v26, %v240_v30  ;;  %v274_v37 = vmul.f32 %v273_v35, %v864_v0  ;;  %v281_v38 = vstv %s667_s18  ;;  %s890_s24 = sld [smem:[#allocation4 + $0x3]] }
  0x42   : > { %v664_v40 = vrot.slane %v266_v34, 9  ;;  %v282_v41 = vmul.f32 %v281_v38, %v864_v0  ;;  %s894_s25 = sld [smem:[#allocation2 + $0x200]]  ;;  %v229_v43 = vmax.f32 %v228_v29, 0.0  ;;  %v289_v58 = vstv %s878_s19 }
  0x43   : > { %v256_v44 = vadd.f32 %v660_v31, %v248_v36  ;;  %v666_v45 = vrot.slane %v274_v37, 10  ;;  %v293_v46 = vstv %s881_s20  ;;  %s899_s26 = sld [smem:[#allocation2 + $0x201]]  ;;  %s713_s20 = sshll.u32 %s1020_s13, 4 }
  0x44   : > { %v271_v47 = vadd.f32 %v664_v40, %v263_v33  ;;  %v668_v48 = vrot.slane %v282_v41, 11  ;;  %v296_v49 = vstv %s883_s21  ;;  %s902_s27 = sld [smem:[#allocation2 + $0x202]]  ;;  %v294_v52 = vmul.f32 %v293_v46, %v864_v0 }
  0x45   : > { %v259_v51 = vadd.f32 %v258_v39, %v256_v44  ;;  %v297_v53 = vmul.f32 %v296_v49, %v864_v0  ;;  %v304_v54 = vstv %s673_s22  ;;  %s908_s28 = sld [smem:[#allocation2 + $0x203]]  ;;  %v451_v61 = vrot.slane %v229_v43, %v896_v42 }
  0x46   : > { %v279_v55 = vadd.f32 %v666_v45, %v271_v47  ;;  %v305_v56 = vmul.f32 %v304_v54, %v864_v0  ;;  %v312_v57 = vstv %s887_s23  ;;  %s912_s29 = sld [smem:[#allocation4 + $0x4]]  ;;  %v455_v6 = vrot.slane %v229_v43, %v904_v50  ;;  %s197_s23 = scalar_lea.vmem %s1009_s3, %s713_s20 }
  0x47   : > { %v672_v59 = vrot.slane %v297_v53, 9  ;;  %v313_v60 = vmul.f32 %v312_v57, %v864_v0  ;;  %s916_s30 = sld [smem:[#allocation2 + $0x280]]  ;;  %v260_v62 = vmax.f32 %v259_v51, 0.0  ;;  %v320_v12 = vstv %s890_s24 }
  0x48   : > { %v287_v63 = vadd.f32 %v668_v48, %v279_v55  ;;  %v674_v1 = vrot.slane %v305_v56, 10  ;;  %v324_v2 = vstv %s894_s25  ;;  %s920_s4 = sld [smem:[#allocation2 + $0x281]] }
  0x49   : > { %v302_v3 = vadd.f32 %v672_v59, %v294_v52  ;;  %v676_v4 = vrot.slane %v313_v60, 11  ;;  %v327_v5 = vstv %s899_s26  ;;  %s923_s5 = sld [smem:[#allocation2 + $0x282]]  ;;  %v325_v8 = vmul.f32 %v324_v2, %v864_v0 }
  0x4a   : > { %v290_v7 = vadd.f32 %v289_v58, %v287_v63  ;;  %v328_v9 = vmul.f32 %v327_v5, %v864_v0  ;;  %v335_v10 = vstv %s902_s27  ;;  %s929_s6 = sld [smem:[#allocation2 + $0x283]]  ;;  %v462_v17 = vrot.slane %v260_v62, %v896_v42 }
  0x4b   : > { %v310_v11 = vadd.f32 %v674_v1, %v302_v3  ;;  %v336_v13 = vmul.f32 %v335_v10, %v864_v0  ;;  %v343_v14 = vstv %s908_s28  ;;  %s934_s7 = sld [smem:[#allocation4 + $0x5]]  ;;  %v466_v18 = vrot.slane %v260_v62, %v904_v50 }
  0x4c   : > { %v680_v15 = vrot.slane %v328_v9, 9  ;;  %v344_v16 = vmul.f32 %v343_v14, %v864_v0  ;;  %s937_s8 = sld [smem:[#allocation2 + $0x300]]  ;;  %v291_v19 = vmax.f32 %v290_v7, 0.0  ;;  %v351_v25 = vstv %s912_s29 }
  0x4d   : > { %v318_v20 = vadd.f32 %v676_v4, %v310_v11  ;;  %v682_v21 = vrot.slane %v336_v13, 10  ;;  %v355_v22 = vstv %s916_s30  ;;  %s942_s9 = sld [smem:[#allocation2 + $0x301]]  ;;  %v536_v34 = vsel %vm535_vm0, %v451_v61, %v462_v17 }
  0x4e   : > { %v333_v23 = vadd.f32 %v680_v15, %v325_v8  ;;  %v684_v24 = vrot.slane %v344_v16, 11  ;;  %v358_v26 = vstv %s920_s4  ;;  %s946_s10 = sld [smem:[#allocation2 + $0x302]]  ;;  %v356_v28 = vmul.f32 %v355_v22, %v864_v0 }
  0x4f   : > { %v321_v27 = vadd.f32 %v320_v12, %v318_v20  ;;  %v359_v29 = vmul.f32 %v358_v26, %v864_v0  ;;  %v366_v30 = vstv %s923_s5  ;;  %s951_s11 = sld [smem:[#allocation2 + $0x303]]  ;;  %v473_v37 = vrot.slane %v291_v19, %v896_v42 }
  0x50   : > { %v341_v31 = vadd.f32 %v682_v21, %v333_v23  ;;  %v367_v32 = vmul.f32 %v366_v30, %v864_v0  ;;  %v374_v33 = vstv %s929_s6  ;;  %s955_s14 = sld [smem:[#allocation4 + $0x6]]  ;;  %v477_v38 = vrot.slane %v291_v19, %v904_v50 }
  0x51   : > { %v688_v35 = vrot.slane %v359_v29, 9  ;;  %v375_v36 = vmul.f32 %v374_v33, %v864_v0  ;;  %s959_s15 = sld [smem:[#allocation2 + $0x380]]  ;;  %v322_v39 = vmax.f32 %v321_v27, 0.0  ;;  %v382_v46 = vstv %s934_s7 }
  0x52   : > { %v349_v40 = vadd.f32 %v684_v24, %v341_v31  ;;  %v690_v41 = vrot.slane %v367_v32, 10  ;;  %v386_v43 = vstv %s937_s8  ;;  %s964_s16 = sld [smem:[#allocation2 + $0x381]]  ;;  %v537_v56 = vsel %vm535_vm0, %v455_v6, %v466_v18 }
  0x53   : > { %v364_v44 = vadd.f32 %v688_v35, %v356_v28  ;;  %v692_v45 = vrot.slane %v375_v36, 11  ;;  %v389_v47 = vstv %s942_s9  ;;  %s705_s17 = sld [smem:[#allocation2 + $0x382]]  ;;  %v387_v49 = vmul.f32 %v386_v43, %v864_v0 }
  0x54   : > { %v352_v48 = vadd.f32 %v351_v25, %v349_v40  ;;  %v390_v51 = vmul.f32 %v389_v47, %v864_v0  ;;  %v397_v52 = vstv %s946_s10  ;;  %s707_s18 = sld [smem:[#allocation2 + $0x383]]  ;;  %v484_v59 = vrot.slane %v322_v39, %v896_v42 }
  0x55   : > { %v372_v53 = vadd.f32 %v690_v41, %v364_v44  ;;  %v398_v54 = vmul.f32 %v397_v52, %v864_v0  ;;  %v405_v55 = vstv %s951_s11  ;;  %v488_v60 = vrot.slane %v322_v39, %v904_v50  ;;  %s980_s19 = sld [smem:[#allocation4 + $0x7]] }
  0x56   : > { %v696_v57 = vrot.slane %v390_v51, 9  ;;  %v406_v58 = vmul.f32 %v405_v55, %v864_v0  ;;  %v353_v61 = vmax.f32 %v352_v48, 0.0  ;;  %v413_v4 = vstv %s955_s14 }
  0x57   : > { %v380_v62 = vadd.f32 %v692_v45, %v372_v53  ;;  %v698_v63 = vrot.slane %v398_v54, 10  ;;  %v417_v1 = vstv %s959_s15  ;;  %v539_v13 = vsel %vm538_vm1, %v536_v34, %v473_v37 }
  0x58   : > { %v395_v2 = vadd.f32 %v696_v57, %v387_v49  ;;  %v700_v3 = vrot.slane %v406_v58, 11  ;;  %v420_v5 = vstv %s964_s16  ;;  %v418_v6 = vmul.f32 %v417_v1, %v864_v0 }
  0x59   : > { %v383_v7 = vadd.f32 %v382_v46, %v380_v62  ;;  %v421_v8 = vmul.f32 %v420_v5, %v864_v0  ;;  %v428_v9 = vstv %s705_s17  ;;  %v495_v17 = vrot.slane %v353_v61, %v896_v42 }
  0x5a   : > { %v403_v10 = vadd.f32 %v698_v63, %v395_v2  ;;  %v429_v11 = vmul.f32 %v428_v9, %v864_v0  ;;  %v436_v12 = vstv %s707_s18  ;;  %v499_v20 = vrot.slane %v353_v61, %v904_v50 }
  0x5b   : > { %v384_v14 = vmax.f32 %v383_v7, 0.0  ;;  %v704_v15 = vrot.slane %v421_v8, 9  ;;  %v437_v16 = vmul.f32 %v436_v12, %v864_v0  ;;  %v540_v21 = vsel %vm538_vm1, %v537_v56, %v477_v38 }
  0x5c   : > { %v411_v18 = vadd.f32 %v700_v3, %v403_v10  ;;  %v706_v19 = vrot.slane %v429_v11, 10  ;;  %v542_v24 = vsel %vm541_vm2, %v539_v13, %v484_v59  ;;  %v543_v26 = vsel %vm541_vm2, %v540_v21, %v488_v60 }
  0x5d   : > { %v426_v22 = vadd.f32 %v704_v15, %v418_v6  ;;  %v708_v23 = vrot.slane %v437_v16, 11  ;;  %v506_v0 = vrot.slane %v384_v14, %v896_v42  ;;  %v510_v28 = vrot.slane %v384_v14, %v904_v50 }
  0x5e   : > { %v414_v25 = vadd.f32 %v413_v4, %v411_v18  ;;  %v444_v30 = vstv %s980_s19  ;;  %v545_v31 = vsel %vm544_vm3, %v542_v24, %v495_v17  ;;  %v546_v32 = vsel %vm544_vm3, %v543_v26, %v499_v20 }
  0x5f   : > { %v434_v27 = vadd.f32 %v706_v19, %v426_v22  ;;  %v548_v37 = vsel %vm547_vm4, %v545_v31, %v506_v0  ;;  %v549_v38 = vsel %vm547_vm4, %v546_v32, %v510_v28 }
  0x60   : > { %v415_v29 = vmax.f32 %v414_v25, 0.0 }
  0x61   : > { %v442_v33 = vadd.f32 %v708_v23, %v434_v27 }
  0x62   : > { %v517_v34 = vrot.slane %v415_v29, %v896_v42  ;;  %v521_v35 = vrot.slane %v415_v29, %v904_v50 }
  0x63   : > { %v445_v36 = vadd.f32 %v444_v30, %v442_v33 }
  0x64   : > { %v551_v40 = vsel %vm550_vm5, %v548_v37, %v517_v34  ;;  %v552_v41 = vsel %vm550_vm5, %v549_v38, %v521_v35 }
  0x65   : > { %v446_v39 = vmax.f32 %v445_v36, 0.0 }
  0x67   : > { %v528_v43 = vrot.slane %v446_v39, %v896_v42  ;;  %v532_v44 = vrot.slane %v446_v39, %v904_v50 }
  0x69   : > { %v554_v45 = vsel %vm553_vm6, %v551_v40, %v528_v43  ;;  %v555_v46 = vsel %vm553_vm6, %v552_v41, %v532_v44 }
  0x6a   : > { %556 = vst [vmem:[%s197_s23] sm:$0xff] %v554_v45  ;;  %557 = vst [vmem:[%s197_s23 + $0x8] sm:$0xff] %v555_v46 }
  0x6b PF: > { %s15_s12 = sadd.s32 1, %s787_s12  }
  0x6c   : > { %p12_p5 = scmp.ge.s32.totalorder %s15_s12, 4  }
  0x6e   :  { %14 = sbr.rel (!%p12_p5) target bundleno = 2 (0x2), region = 71 }
  0x73   :  { %579 = vsyncpa [#allocation3], 1 }
  0x74   :  { %581 = vsyncpa [#allocation3 + $0x1], 1 }
  0x75   :  { %582 = vsyncpa [#allocation5], 1 }

</bundles_post_ra>
